<compile_context>
chip_gen: v5e
topology: v5e:2x2
jax: 0.10.0
libtpu: 0.0.40
codegen_flags: <defaults>
</compile_context>

<pallas_src>
import functools
import math
import re

import jax
import jax.numpy as jnp
from jax.experimental import pallas as pl
from jax.experimental.pallas import tpu as pltpu


def attention_kernel(v_ref, h_ref, s_ref,
                     wh_ref, bh_ref, bhv_ref,
                     wv_ref, wz_ref,
                     ws_ref, bs_ref, wb_ref,
                     bz_ref, bb_ref,
                     c_ref, *, num_valid_l, tanh_dtype):
    TB, Lp, H = v_ref.shape
    f32, bf16 = jnp.float32, jnp.bfloat16

    v = v_ref[...]                                                        # (TB, Lp, H) bf16
    h = h_ref[...]                                                        # (TB, H) f32
    s = s_ref[...]                                                        # (TB, H) f32

    # h @ Wh once; bh for the beta branch, (bh + bv) folded for the z branch.
    hW = jnp.dot(h.astype(bf16), wh_ref[...], preferred_element_type=f32)  # (TB, H)
    h_proj = hW + bh_ref[...]                                             # (TB, H)
    hz = hW + bhv_ref[...]                                                # (TB, H)

    # v_proj = v @ Wv (bias folded above); flatten is tile-aligned (Lp % 16 == 0).
    v2 = v.reshape(TB * Lp, H)
    v_proj = jnp.dot(v2, wv_ref[...],
                     preferred_element_type=f32).reshape(TB, Lp, H)       # (TB, Lp, H)

    # z = tanh(h.unsqueeze(1) + v_proj)
    # bf16 tanh on v6e/v7x (bf16 EUP); f32 on v5e/older (passed statically).
    z = jnp.tanh((hz[:, None, :] + v_proj).astype(tanh_dtype))            # (TB, Lp, H)

    # z_score = linear_z(z): VPU multiply + lane reduce over H (keeps the
    # 128x-overprovisioned H->1 matvec off the MXU).  Product promotes to f32.
    z_score = (jnp.sum(z * wz_ref[...], axis=-1, keepdims=True)
               + bz_ref[0, 0])                                            # (TB, Lp, 1)

    # Mask zero-padded region positions out of the softmax.
    l_idx = jax.lax.broadcasted_iota(jnp.int32, (TB, Lp, 1), 1)
    z_score = jnp.where(l_idx < num_valid_l, z_score, -1e30)

    # beta = tanh((linear_s(s) + h_proj) * sqrt(0.5)); beta_score = linear_beta(beta)
    s_proj = (jnp.dot(s.astype(bf16), ws_ref[...],
                      preferred_element_type=f32) + bs_ref[...])          # (TB, H)
    beta = jnp.tanh((s_proj + h_proj) * math.sqrt(0.5))                   # (TB, H) f32
    beta_score = (jnp.sum(beta * wb_ref[...], axis=-1, keepdims=True)
                  + bb_ref[0, 0])[:, :, None]                             # (TB, 1, 1)

    # softmax(concat([z_score, beta_score], dim=1)) without materializing concat.
    m = jnp.maximum(jnp.max(z_score, axis=1, keepdims=True), beta_score)  # (TB, 1, 1)
    ez = jnp.exp(z_score - m)                                             # (TB, Lp, 1)
    eb = jnp.exp(beta_score - m)                                          # (TB, 1, 1)
    denom = jnp.sum(ez, axis=1, keepdims=True) + eb                       # (TB, 1, 1)
    inv = 1.0 / denom                                                     # exact (cheap)
    a_z = ez * inv                                                        # (TB, Lp, 1) f32
    a_b = eb * inv                                                        # (TB, 1, 1)

    # c = sum_l a[:, l] * v[:, l, :] + a[:, L] * s : VPU multiply + L-reduce
    # (padded L rows have a_z ~ 0 and v == 0).
    c_v = jnp.sum(a_z * v, axis=1)                                        # (TB, H) f32
    c_ref[...] = (c_v + a_b[:, 0, :] * s).astype(c_ref.dtype)


def _tpu_generation():
    """Best-effort TPU generation number (5, 6, 7, ...); 0 if unknown."""
    try:
        kind = jax.devices()[0].device_kind
    except Exception:
        return 0
    m = re.search(r"(\d+)", kind)
    return int(m.group(1)) if m else 0


def attention_forward(v, h, s, params, *, block_b=None):
    """v: (B, L, H); h, s: (B, H). params as produced by make_params (f32)."""
    B, L, H = v.shape
    wh, bh, wv, bv, wz, bz, ws, bs, wb, bb = params
    f32, bf16 = jnp.float32, jnp.bfloat16

    gen = _tpu_generation()
    # Per-generation tiling: bigger batch tiles on v5e/v6e (128 MiB VMEM), capped
    # on v7x (64 MiB VMEM); conservative default on unknown chips.
    if block_b is None:
        block_b = 64 if gen >= 7 else (128 if gen in (5, 6) else 64)
    tanh_dtype = bf16 if gen >= 6 else f32
    if gen >= 7:
        vmem_limit = 48 * 1024 * 1024
    elif gen in (5, 6):
        vmem_limit = 96 * 1024 * 1024
    else:
        vmem_limit = None  # keep the platform default

    TB = min(block_b, B)
    nb = -(-B // TB)
    B_pad = nb * TB
    L_pad = ((L + 15) // 16) * 16   # bf16 sublane packing: 16 rows per vreg

    # Pad batch / region dims with zero rows; cast the streamed tensor to bf16.
    v_p = jnp.zeros((B_pad, L_pad, H), bf16).at[:B, :L, :].set(v.astype(bf16))
    h_p = jnp.zeros((B_pad, H), f32).at[:B].set(h.astype(f32))
    s_p = jnp.zeros((B_pad, H), f32).at[:B].set(s.astype(f32))

    # Fold linear_v's bias into the broadcast h-projection for the z branch.
    bhv = (bh + bv).astype(f32)

    kernel = functools.partial(attention_kernel, num_valid_l=L,
                               tanh_dtype=tanh_dtype)

    batch_spec_3d = pl.BlockSpec((TB, L_pad, H), lambda i: (i, 0, 0))
    batch_spec_2d = pl.BlockSpec((TB, H), lambda i: (i, 0))

    def resident(shape):            # weights: constant block index -> stay in VMEM
        return pl.BlockSpec(shape, lambda i: (0,) * len(shape))

    smem_scalar = pl.BlockSpec(memory_space=pltpu.MemorySpace.SMEM)

    out = pl.pallas_call(
        kernel,
        out_shape=jax.ShapeDtypeStruct((B_pad, H), f32),
        grid=(nb,),
        in_specs=[
            batch_spec_3d,            # v        (bf16, streamed & double-buffered)
            batch_spec_2d,            # h
            batch_spec_2d,            # s
            resident((H, H)),         # wh       (bf16)
            resident((1, H)),         # bh
            resident((1, H)),         # bh + bv  (folded z-branch bias)
            resident((H, H)),         # wv       (bf16)
            resident((1, H)),         # wz       (f32, VPU path)
            resident((H, H)),         # ws       (bf16)
            resident((1, H)),         # bs
            resident((1, H)),         # wb       (f32, VPU path)
            smem_scalar,              # bz       (1,1) scalar in SMEM
            smem_scalar,              # bb       (1,1) scalar in SMEM
        ],
        out_specs=batch_spec_2d,
        compiler_params=pltpu.CompilerParams(
            dimension_semantics=("parallel",),
            vmem_limit_bytes=vmem_limit),
    )(v_p, h_p, s_p,
      wh.astype(bf16), bh.astype(f32), bhv,
      wv.astype(bf16),
      wz.reshape(1, H).astype(f32),
      ws.astype(bf16), bs.astype(f32),
      wb.reshape(1, H).astype(f32),
      bz.astype(f32), bb.astype(f32))

    return out[:B]


def reference_forward(v, h, s, params):
    """Pure-JAX f32 reference mirroring the PyTorch module in eval mode."""
    wh, bh, wv, bv, wz, bz, ws, bs, wb, bb = params
    h_proj = h @ wh + bh[0]
    v_proj = v @ wv + bv[0]
    z = jnp.tanh(h_proj[:, None, :] + v_proj)
    z_score = jnp.einsum('blh,h->bl', z, wz[0]) + bz[0, 0]
    beta = jnp.tanh((s @ ws + bs[0] + h_proj) * math.sqrt(0.5))
    beta_score = beta @ wb[0] + bb[0, 0]                      # (B,)
    logits = jnp.concatenate([z_score, beta_score[:, None]], axis=1)
    a = jax.nn.softmax(logits, axis=1)
    v_cat = jnp.concatenate([v, s[:, None, :]], axis=1)
    return jnp.sum(a[:, :, None] * v_cat, axis=1)


def make_params(key, H):
    ks = jax.random.split(key, 10)
    sc = 0.1
    wh = jax.random.normal(ks[0], (H, H), jnp.float32) * sc
    bh = jax.random.normal(ks[1], (1, H), jnp.float32) * sc
    wv = jax.random.normal(ks[2], (H, H), jnp.float32) * sc
    bv = jax.random.normal(ks[3], (1, H), jnp.float32) * sc
    wz = jax.random.normal(ks[4], (1, H), jnp.float32) * sc
    bz = jax.random.normal(ks[5], (1, 1), jnp.float32) * sc
    ws = jax.random.normal(ks[6], (H, H), jnp.float32) * sc
    bs = jax.random.normal(ks[7], (1, H), jnp.float32) * sc
    wb = jax.random.normal(ks[8], (1, H), jnp.float32) * sc
    bb = jax.random.normal(ks[9], (1, 1), jnp.float32) * sc
    return (wh, bh, wv, bv, wz, bz, ws, bs, wb, bb)


if __name__ == "__main__":
    # Small analogue of [bsz x 49 x 512]; L=7 (not a multiple of 16) exercises
    # the region-padding + softmax-mask path just like L=49 would.
    B, L, H = 2, 7, 32
    key = jax.random.PRNGKey(0)
    kv, kh, ks_, kp = jax.random.split(key, 4)
    v = jax.random.normal(kv, (B, L, H), jnp.float32)
    h = jax.random.normal(kh, (B, H), jnp.float32)
    s = jax.random.normal(ks_, (B, H), jnp.float32)
    params = make_params(kp, H)

    c = attention_forward(v, h, s, params)
    c = jax.block_until_ready(c)

    c_ref = reference_forward(v, h, s, params)
    assert c.shape == (B, H)
    max_diff = float(jnp.max(jnp.abs(c - c_ref)))
    # bf16 MXU operands (+ bf16 tanh on v6e/v7x) vs f32 reference: loosened tolerance.
    assert jnp.allclose(c, c_ref, atol=3e-2, rtol=3e-2), f"max abs diff {max_diff}"
    print("KERNEL_OK")
</pallas_src>

<mosaic_0001>
module attributes {stable_mosaic.version = 11 : i64} {
  func.func @attention_kernel(%arg0: i32, %arg1: memref<2x16x32xbf16, #tpu.memory_space<vmem>>, %arg2: memref<2x32xf32, #tpu.memory_space<vmem>>, %arg3: memref<2x32xf32, #tpu.memory_space<vmem>>, %arg4: memref<32x32xbf16, #tpu.memory_space<vmem>>, %arg5: memref<1x32xf32, #tpu.memory_space<vmem>>, %arg6: memref<1x32xf32, #tpu.memory_space<vmem>>, %arg7: memref<32x32xbf16, #tpu.memory_space<vmem>>, %arg8: memref<1x32xf32, #tpu.memory_space<vmem>>, %arg9: memref<32x32xbf16, #tpu.memory_space<vmem>>, %arg10: memref<1x32xf32, #tpu.memory_space<vmem>>, %arg11: memref<1x32xf32, #tpu.memory_space<vmem>>, %arg12: memref<1x1xf32, #tpu.memory_space<smem>>, %arg13: memref<1x1xf32, #tpu.memory_space<smem>>, %arg14: memref<2x32xf32, #tpu.memory_space<vmem>>) attributes {dimension_semantics = [#tpu.dimension_semantics<parallel>], iteration_bounds = array<i64: 1>, scalar_prefetch = 0 : i64, scratch_operands = 0 : i64, tpu.core_type = #tpu.core_type<tc>, window_params = [{transform_indices = @transform_0, window_bounds = array<i64: 2, 16, 32>}, {transform_indices = @transform_1, window_bounds = array<i64: 2, 32>}, {transform_indices = @transform_2, window_bounds = array<i64: 2, 32>}, {pipeline_mode = #tpu.pipeline_mode<synchronous>, transform_indices = @transform_3, window_bounds = array<i64: 32, 32>}, {pipeline_mode = #tpu.pipeline_mode<synchronous>, transform_indices = @transform_4, window_bounds = array<i64: 1, 32>}, {pipeline_mode = #tpu.pipeline_mode<synchronous>, transform_indices = @transform_5, window_bounds = array<i64: 1, 32>}, {pipeline_mode = #tpu.pipeline_mode<synchronous>, transform_indices = @transform_6, window_bounds = array<i64: 32, 32>}, {pipeline_mode = #tpu.pipeline_mode<synchronous>, transform_indices = @transform_7, window_bounds = array<i64: 1, 32>}, {pipeline_mode = #tpu.pipeline_mode<synchronous>, transform_indices = @transform_8, window_bounds = array<i64: 32, 32>}, {pipeline_mode = #tpu.pipeline_mode<synchronous>, transform_indices = @transform_9, window_bounds = array<i64: 1, 32>}, {pipeline_mode = #tpu.pipeline_mode<synchronous>, transform_indices = @transform_10, window_bounds = array<i64: 1, 32>}, {transform_indices = @transform_11, window_bounds = array<i64: 1, 1>}, {transform_indices = @transform_12, window_bounds = array<i64: 1, 1>}, {transform_indices = @transform_13, window_bounds = array<i64: 2, 32>}]} {
    %c0 = arith.constant 0 : index
    %c0_0 = arith.constant 0 : index
    %c0_1 = arith.constant 0 : index
    %0 = vector.load %arg1[%c0, %c0_0, %c0_1] : memref<2x16x32xbf16, #tpu.memory_space<vmem>>, vector<2x16x32xbf16>
    %c0_2 = arith.constant 0 : index
    %c0_3 = arith.constant 0 : index
    %1 = vector.load %arg2[%c0_2, %c0_3] : memref<2x32xf32, #tpu.memory_space<vmem>>, vector<2x32xf32>
    %c0_4 = arith.constant 0 : index
    %c0_5 = arith.constant 0 : index
    %2 = vector.load %arg3[%c0_4, %c0_5] : memref<2x32xf32, #tpu.memory_space<vmem>>, vector<2x32xf32>
    %3 = arith.truncf %1 : vector<2x32xf32> to vector<2x32xbf16>
    %c0_6 = arith.constant 0 : index
    %c0_7 = arith.constant 0 : index
    %4 = vector.load %arg4[%c0_6, %c0_7] : memref<32x32xbf16, #tpu.memory_space<vmem>>, vector<32x32xbf16>
    %cst = arith.constant dense<0.000000e+00> : vector<2x32xf32>
    %5 = tpu.matmul %3, %4, %cst {dimension_numbers = #tpu.dot_dimension_numbers<[1], [0], [0], [1], [0, 0, 1, 1], [], []>} : vector<2x32xbf16>, vector<32x32xbf16>, vector<2x32xf32> -> vector<2x32xf32>
    %c0_8 = arith.constant 0 : index
    %c0_9 = arith.constant 0 : index
    %6 = vector.load %arg5[%c0_8, %c0_9] : memref<1x32xf32, #tpu.memory_space<vmem>>, vector<1x32xf32>
    %7 = vector.broadcast %6 : vector<1x32xf32> to vector<2x32xf32>
    %8 = arith.addf %5, %7 : vector<2x32xf32>
    %c0_10 = arith.constant 0 : index
    %c0_11 = arith.constant 0 : index
    %9 = vector.load %arg6[%c0_10, %c0_11] : memref<1x32xf32, #tpu.memory_space<vmem>>, vector<1x32xf32>
    %10 = vector.broadcast %9 : vector<1x32xf32> to vector<2x32xf32>
    %11 = arith.addf %5, %10 : vector<2x32xf32>
    %12 = vector.shape_cast %0 : vector<2x16x32xbf16> to vector<32x32xbf16>
    %c0_12 = arith.constant 0 : index
    %c0_13 = arith.constant 0 : index
    %13 = vector.load %arg7[%c0_12, %c0_13] : memref<32x32xbf16, #tpu.memory_space<vmem>>, vector<32x32xbf16>
    %cst_14 = arith.constant dense<0.000000e+00> : vector<32x32xf32>
    %14 = tpu.matmul %12, %13, %cst_14 {dimension_numbers = #tpu.dot_dimension_numbers<[1], [0], [0], [1], [0, 0, 1, 1], [], []>} : vector<32x32xbf16>, vector<32x32xbf16>, vector<32x32xf32> -> vector<32x32xf32>
    %15 = vector.shape_cast %14 : vector<32x32xf32> to vector<2x16x32xf32>
    %16 = vector.shape_cast %11 : vector<2x32xf32> to vector<2x1x32xf32>
    %17 = vector.broadcast %16 : vector<2x1x32xf32> to vector<2x16x32xf32>
    %18 = arith.addf %17, %15 : vector<2x16x32xf32>
    %19 = math.tanh %18 : vector<2x16x32xf32>
    %c0_15 = arith.constant 0 : index
    %c0_16 = arith.constant 0 : index
    %20 = vector.load %arg8[%c0_15, %c0_16] : memref<1x32xf32, #tpu.memory_space<vmem>>, vector<1x32xf32>
    %21 = vector.shape_cast %20 : vector<1x32xf32> to vector<1x1x32xf32>
    %22 = vector.broadcast %21 : vector<1x1x32xf32> to vector<2x16x32xf32>
    %23 = arith.mulf %19, %22 : vector<2x16x32xf32>
    %cst_17 = arith.constant dense<0.000000e+00> : vector<2x16xf32>
    %24 = vector.multi_reduction <add>, %23, %cst_17 [2] : vector<2x16x32xf32> to vector<2x16xf32>
    %25 = vector.shape_cast %24 : vector<2x16xf32> to vector<2x16x1xf32>
    %c0_18 = arith.constant 0 : index
    %c0_19 = arith.constant 0 : index
    %26 = memref.load %arg12[%c0_18, %c0_19] : memref<1x1xf32, #tpu.memory_space<smem>>
    %27 = vector.broadcast %26 : f32 to vector<2x16x1xf32>
    %28 = arith.addf %25, %27 : vector<2x16x1xf32>
    %29 = tpu.iota {dimensions = array<i32: 1>} : vector<2x16x1xi32>
    %c7_i32 = arith.constant 7 : i32
    %30 = vector.broadcast %c7_i32 : i32 to vector<2x16x1xi32>
    %31 = arith.cmpi slt, %29, %30 : vector<2x16x1xi32>
    %cst_20 = arith.constant -1.000000e+30 : f32
    %32 = vector.broadcast %cst_20 : f32 to vector<2x16x1xf32>
    %33 = arith.select %31, %28, %32 : vector<2x16x1xi1>, vector<2x16x1xf32>
    %34 = arith.truncf %2 : vector<2x32xf32> to vector<2x32xbf16>
    %c0_21 = arith.constant 0 : index
    %c0_22 = arith.constant 0 : index
    %35 = vector.load %arg9[%c0_21, %c0_22] : memref<32x32xbf16, #tpu.memory_space<vmem>>, vector<32x32xbf16>
    %cst_23 = arith.constant dense<0.000000e+00> : vector<2x32xf32>
    %36 = tpu.matmul %34, %35, %cst_23 {dimension_numbers = #tpu.dot_dimension_numbers<[1], [0], [0], [1], [0, 0, 1, 1], [], []>} : vector<2x32xbf16>, vector<32x32xbf16>, vector<2x32xf32> -> vector<2x32xf32>
    %c0_24 = arith.constant 0 : index
    %c0_25 = arith.constant 0 : index
    %37 = vector.load %arg10[%c0_24, %c0_25] : memref<1x32xf32, #tpu.memory_space<vmem>>, vector<1x32xf32>
    %38 = vector.broadcast %37 : vector<1x32xf32> to vector<2x32xf32>
    %39 = arith.addf %36, %38 : vector<2x32xf32>
    %40 = arith.addf %39, %8 : vector<2x32xf32>
    %cst_26 = arith.constant 0.707106769 : f32
    %41 = vector.broadcast %cst_26 : f32 to vector<2x32xf32>
    %42 = arith.mulf %40, %41 : vector<2x32xf32>
    %43 = math.tanh %42 : vector<2x32xf32>
    %c0_27 = arith.constant 0 : index
    %c0_28 = arith.constant 0 : index
    %44 = vector.load %arg11[%c0_27, %c0_28] : memref<1x32xf32, #tpu.memory_space<vmem>>, vector<1x32xf32>
    %45 = vector.broadcast %44 : vector<1x32xf32> to vector<2x32xf32>
    %46 = arith.mulf %43, %45 : vector<2x32xf32>
    %cst_29 = arith.constant dense<0.000000e+00> : vector<2xf32>
    %47 = vector.multi_reduction <add>, %46, %cst_29 [1] : vector<2x32xf32> to vector<2xf32>
    %48 = vector.shape_cast %47 : vector<2xf32> to vector<2x1xf32>
    %c0_30 = arith.constant 0 : index
    %c0_31 = arith.constant 0 : index
    %49 = memref.load %arg13[%c0_30, %c0_31] : memref<1x1xf32, #tpu.memory_space<smem>>
    %50 = vector.broadcast %49 : f32 to vector<2x1xf32>
    %51 = arith.addf %48, %50 : vector<2x1xf32>
    %52 = vector.shape_cast %51 : vector<2x1xf32> to vector<2x1x1xf32>
    %cst_32 = arith.constant dense<0xFF800000> : vector<2x1xf32>
    %53 = vector.multi_reduction <maximumf>, %33, %cst_32 [1] : vector<2x16x1xf32> to vector<2x1xf32>
    %54 = vector.shape_cast %53 : vector<2x1xf32> to vector<2x1x1xf32>
    %55 = arith.maximumf %54, %52 : vector<2x1x1xf32>
    %56 = vector.broadcast %55 : vector<2x1x1xf32> to vector<2x16x1xf32>
    %57 = arith.subf %33, %56 : vector<2x16x1xf32>
    %58 = math.exp %57 : vector<2x16x1xf32>
    %59 = arith.subf %52, %55 : vector<2x1x1xf32>
    %60 = math.exp %59 : vector<2x1x1xf32>
    %cst_33 = arith.constant dense<0.000000e+00> : vector<2x1xf32>
    %61 = vector.multi_reduction <add>, %58, %cst_33 [1] : vector<2x16x1xf32> to vector<2x1xf32>
    %62 = vector.shape_cast %61 : vector<2x1xf32> to vector<2x1x1xf32>
    %63 = arith.addf %62, %60 : vector<2x1x1xf32>
    %cst_34 = arith.constant 1.000000e+00 : f32
    %64 = vector.broadcast %cst_34 : f32 to vector<2x1x1xf32>
    %65 = arith.divf %64, %63 : vector<2x1x1xf32>
    %66 = vector.broadcast %65 : vector<2x1x1xf32> to vector<2x16x1xf32>
    %67 = arith.mulf %58, %66 : vector<2x16x1xf32>
    %68 = arith.mulf %60, %65 : vector<2x1x1xf32>
    %69 = arith.extf %0 : vector<2x16x32xbf16> to vector<2x16x32xf32>
    %70 = vector.broadcast %67 : vector<2x16x1xf32> to vector<2x16x32xf32>
    %71 = arith.mulf %70, %69 : vector<2x16x32xf32>
    %cst_35 = arith.constant dense<0.000000e+00> : vector<2x32xf32>
    %72 = vector.multi_reduction <add>, %71, %cst_35 [1] : vector<2x16x32xf32> to vector<2x32xf32>
    %73 = vector.shape_cast %68 : vector<2x1x1xf32> to vector<2x1xf32>
    %74 = vector.broadcast %73 : vector<2x1xf32> to vector<2x32xf32>
    %75 = arith.mulf %74, %2 : vector<2x32xf32>
    %76 = arith.addf %72, %75 : vector<2x32xf32>
    %c0_36 = arith.constant 0 : index
    %c0_37 = arith.constant 0 : index
    %77 = vector.load %arg14[%c0_36, %c0_37] : memref<2x32xf32, #tpu.memory_space<vmem>>, vector<2x32xf32>
    tpu.vector_store %arg14[%c0_36, %c0_37], %76 {strides = array<i32>} : memref<2x32xf32, #tpu.memory_space<vmem>>, vector<2x32xf32>,
    return
  }
  func.func @transform_0(%arg0: i32) -> (i32, i32, i32) {
    %c0_i32 = arith.constant 0 : i32
    %c0_i32_0 = arith.constant 0 : i32
    %c0_i32_1 = arith.constant 0 : i32
    return %arg0, %c0_i32, %c0_i32_0 : i32, i32, i32
  }
  func.func @transform_1(%arg0: i32) -> (i32, i32) {
    %c0_i32 = arith.constant 0 : i32
    %c0_i32_0 = arith.constant 0 : i32
    return %arg0, %c0_i32 : i32, i32
  }
  func.func @transform_2(%arg0: i32) -> (i32, i32) {
    %c0_i32 = arith.constant 0 : i32
    %c0_i32_0 = arith.constant 0 : i32
    return %arg0, %c0_i32 : i32, i32
  }
  func.func @transform_3(%arg0: i32) -> (i32, i32) {
    %c0_i32 = arith.constant 0 : i32
    %c0_i32_0 = arith.constant 0 : i32
    %c0_i32_1 = arith.constant 0 : i32
    return %c0_i32, %c0_i32_0 : i32, i32
  }
  func.func @transform_4(%arg0: i32) -> (i32, i32) {
    %c0_i32 = arith.constant 0 : i32
    %c0_i32_0 = arith.constant 0 : i32
    %c0_i32_1 = arith.constant 0 : i32
    return %c0_i32, %c0_i32_0 : i32, i32
  }
  func.func @transform_5(%arg0: i32) -> (i32, i32) {
    %c0_i32 = arith.constant 0 : i32
    %c0_i32_0 = arith.constant 0 : i32
    %c0_i32_1 = arith.constant 0 : i32
    return %c0_i32, %c0_i32_0 : i32, i32
  }
  func.func @transform_6(%arg0: i32) -> (i32, i32) {
    %c0_i32 = arith.constant 0 : i32
    %c0_i32_0 = arith.constant 0 : i32
    %c0_i32_1 = arith.constant 0 : i32
    return %c0_i32, %c0_i32_0 : i32, i32
  }
  func.func @transform_7(%arg0: i32) -> (i32, i32) {
    %c0_i32 = arith.constant 0 : i32
    %c0_i32_0 = arith.constant 0 : i32
    %c0_i32_1 = arith.constant 0 : i32
    return %c0_i32, %c0_i32_0 : i32, i32
  }
  func.func @transform_8(%arg0: i32) -> (i32, i32) {
    %c0_i32 = arith.constant 0 : i32
    %c0_i32_0 = arith.constant 0 : i32
    %c0_i32_1 = arith.constant 0 : i32
    return %c0_i32, %c0_i32_0 : i32, i32
  }
  func.func @transform_9(%arg0: i32) -> (i32, i32) {
    %c0_i32 = arith.constant 0 : i32
    %c0_i32_0 = arith.constant 0 : i32
    %c0_i32_1 = arith.constant 0 : i32
    return %c0_i32, %c0_i32_0 : i32, i32
  }
  func.func @transform_10(%arg0: i32) -> (i32, i32) {
    %c0_i32 = arith.constant 0 : i32
    %c0_i32_0 = arith.constant 0 : i32
    %c0_i32_1 = arith.constant 0 : i32
    return %c0_i32, %c0_i32_0 : i32, i32
  }
  func.func @transform_11(%arg0: i32) -> (i32, i32) {
    %c0_i32 = arith.constant 0 : i32
    %c0_i32_0 = arith.constant 0 : i32
    %c0_i32_1 = arith.constant 0 : i32
    return %c0_i32, %c0_i32_0 : i32, i32
  }
  func.func @transform_12(%arg0: i32) -> (i32, i32) {
    %c0_i32 = arith.constant 0 : i32
    %c0_i32_0 = arith.constant 0 : i32
    %c0_i32_1 = arith.constant 0 : i32
    return %c0_i32, %c0_i32_0 : i32, i32
  }
  func.func @transform_13(%arg0: i32) -> (i32, i32) {
    %c0_i32 = arith.constant 0 : i32
    %c0_i32_0 = arith.constant 0 : i32
    return %arg0, %c0_i32 : i32, i32
  }
}

</mosaic_0001>

<bundles_post_ra>
// kernel: tpu_custom_call.1
= control target key start
LH: loop header
LB: loop body
LE: loop exit
PB: predicated region body
PF: predicated region fallthrough
CT: control target
= control target key end

     0   :  { %20 = vsyncpa [#allocation5], 0  ;;  %s822_s0 = inlined_call_operand.hbm [shape: bf16[2,16,32], index: 0, kind: input, shape index: {}]   ;;  %s823_s1 = inlined_call_operand.vmem [shape: f32[2,32], index: 1, kind: input, shape index: {}]   ;;  %s824_s2 = inlined_call_operand.vmem [shape: f32[2,32], index: 2, kind: input, shape index: {}]   ;;  %s825_s3 = inlined_call_operand.hbm [shape: bf16[32,32], index: 3, kind: input, shape index: {}]   ;;  %s826_s4 = inlined_call_operand.vmem [shape: f32[1,32], index: 4, kind: input, shape index: {}]   ;;  %s827_s5 = inlined_call_operand.vmem [shape: f32[1,32], index: 5, kind: input, shape index: {}]   ;;  %s828_s6 = inlined_call_operand.hbm [shape: bf16[32,32], index: 6, kind: input, shape index: {}]   ;;  %s829_s7 = inlined_call_operand.vmem [shape: f32[1,32], index: 7, kind: input, shape index: {}]   ;;  %s830_s8 = inlined_call_operand.hbm [shape: bf16[32,32], index: 8, kind: input, shape index: {}]   ;;  %s831_s9 = inlined_call_operand.vmem [shape: f32[1,32], index: 9, kind: input, shape index: {}]   ;;  %s832_s10 = inlined_call_operand.vmem [shape: f32[1,32], index: 10, kind: input, shape index: {}]   ;;  %s833_s11 = inlined_call_operand.<no memory space> [shape: f32[1,1], index: 11, kind: input, shape index: {}]   ;;  %s834_s12 = inlined_call_operand.<no memory space> [shape: f32[1,1], index: 12, kind: input, shape index: {}]   ;;  %s835_s13 = inlined_call_operand.hbm [shape: f32[2,32], index: 13, kind: output, shape index: {}]  }
   0x1   :  { %21 = vsyncpa [#allocation8], 0 }
   0x2   :  { %22 = vsyncpa [#allocation11], 0 }
   0x3   :  { %23 = vsyncpa [#allocation6], 0  ;;  %s45_s27 = sshll.u32 %s825_s3, 4  ;;  %s677_s28 = smov [#allocation7]   ;;  %s46_s27 = int_to_ptr.hbm [resolvable:$true] %s45_s27 }
   0x4   :  { %s47_s29 = sshll.u32 %s677_s28, 4  ;;  %s28_s15 = sshll.u32 %s822_s0, 4  ;;  %s48_s29 = int_to_ptr.vmem [resolvable:$true] %s47_s29  ;;  %s29_s15 = int_to_ptr.hbm [resolvable:$true] %s28_s15 }
   0x5   :  { %s678_s16 = smov 64   ;;  %s679_s17 = smov 4  }
   0x6   :  { %53 = dma.hbm_to_vmem [thread:$0]  %s46_s27, 256, %s48_s29, [#allocation8], %s678_s16, %s678_s16, %s679_s17  }
   0x7   :  { %s680_s18 = smov [#allocation4]   ;;  %s62_s22 = sshll.u32 %s828_s6, 4  ;;  %s63_s22 = int_to_ptr.hbm [resolvable:$true] %s62_s22 }
   0x8   :  { %s30_s19 = sshll.u32 %s680_s18, 4  ;;  %s77_s24 = sshll.u32 %s830_s8, 4  ;;  %s31_s19 = int_to_ptr.vmem [resolvable:$true] %s30_s19  ;;  %s78_s24 = int_to_ptr.hbm [resolvable:$true] %s77_s24 }
   0x9   :  { %36 = dma.hbm_to_vmem [thread:$0]  %s29_s15, 256, %s31_s19, [#allocation5], %s678_s16, %s678_s16, %s679_s17  }
   0xa   :  { %s681_s25 = smov [#allocation9]   ;;  %s682_s0 = smov [#allocation10]  }
   0xb   :  { %s64_s26 = sshll.u32 %s681_s25, 4  ;;  %s79_s27 = sshll.u32 %s682_s0, 4  ;;  %s65_s26 = int_to_ptr.vmem [resolvable:$true] %s64_s26  ;;  %s80_s27 = int_to_ptr.vmem [resolvable:$true] %s79_s27 }
   0xc   :  { %70 = dma.hbm_to_vmem [thread:$0]  %s63_s22, 256, %s65_s26, [#allocation8], %s678_s16, %s678_s16, %s679_s17  }
   0xd   :  { %85 = dma.hbm_to_vmem [thread:$0]  %s78_s24, 256, %s80_s27, [#allocation11], %s678_s16, %s678_s16, %s679_s17  }
   0xe   :  { %669 = dma.done.wait [#allocation5], 256  }
   0xf   :  { %670 = vsyncadd [#allocation5], 4294967040 }
  0x10   :  { %671 = dma.done.wait [#allocation8], 512  }
  0x11   :  { %672 = vsyncadd [#allocation8], 4294966784 }
  0x12   :  { %673 = dma.done.wait [#allocation11], 256  }
  0x13   :  { %674 = vsyncadd [#allocation11], 4294967040  ;;  %v508_v0 = vld [vmem:[#allocation7 + $0x8] sm:$0xff]  ;;  %v510_v1 = vld [vmem:[#allocation9 + $0x8] sm:$0xff]  ;;  %vm134_vm0 = vcmask 261120   ;;  %vm306_vm1 = vcmask 254976   ;;  %v252_v44 = vlaneseq  ;;  %v247_v46 = vstv %s833_s11 }
  0x14   :  { %v512_v2 = vld [vmem:[#allocation10 + $0x8] sm:$0xff]  ;;  %v507_v3 = vld [vmem:[#allocation7] sm:$0xff]  ;;  %144 = vmatpush.bf16.msra.mxu0 %v508_v0  ;;  %513 = vmatpush.bf16.msra.mxu3 %v510_v1  ;;  %v509_v4 = vld [vmem:[#allocation9] sm:$0xff]  ;;  %v311_v54 = vstv %s834_s12  ;;  %s683_s11 = smov [#allocation12]   ;;  %s457_s22 = sshll.u32 %s835_s13, 4  ;;  %vm446_vm11 = vcmask 1041409   ;;  %s458_s22 = int_to_ptr.hbm [resolvable:$true] %s457_s22 }
  0x15   :  { %v511_v5 = vld [vmem:[#allocation10] sm:$0xff]  ;;  %v115_v6 = vld [vmem:[%s823_s1] sm:$0x3]  ;;  %291 = vmatpush.bf16.msra.mxu2 %v512_v2  ;;  %199 = vmatpush.bf16.msra.mxu1 %v510_v1  ;;  %v506_v9 = vld [vmem:[#allocation4 + $0x8] sm:$0xff]  ;;  %v253_v45 = vshrl.u32 %v252_v44, 7  ;;  %s455_s12 = sshll.u32 %s683_s11, 4  ;;  %s456_s12 = int_to_ptr.vmem [resolvable:$true] %s455_s12 }
  0x16   :  { %v772_v7 = vld [vmem:[%s824_s2] sm:$0x3]  ;;  %v117_v8 = vpack.c.bf16 %v115_v6, %v115_v6 }
  0x17   :  { %v261_v10 = vpack.c.bf16 %v772_v7, %v772_v7  ;;  %v505_v11 = vld [vmem:[#allocation4] sm:$0xff]  ;;  %vm255_vm2 = vcmp.lt.s32.totalorder %v253_v45, 7 }
  0x18   :  { %145 = vmatpush.bf16.msra.mxu0 %v507_v3  ;;  %514 = vmatpush.bf16.msra.mxu3 %v509_v4  ;;  %v523_v12 = vld [vmem:[%s827_s5] ss:$0 sm:$0xff] }
  0x19   :  { %292 = vmatpush.bf16.msra.mxu2 %v511_v5  ;;  %200 = vmatpush.bf16.msra.mxu1 %v509_v4  ;;  %v522_v17 = vld [vmem:[%s826_s4] ss:$0 sm:$0xff] }
  0x1a   :  { %v524_v18 = vld [vmem:[%s831_s9] ss:$0 sm:$0xff] }
  0x1b   :  { %477 = vmatmul.msk.bf16.vlgmr.msra.gmra.mxu0 %vm134_vm0, %v117_v8  ;;  %495 = vmatmul.msk.bf16.vlgmr.msra.gmra.mxu3 %vm134_vm0, %v506_v9  ;;  %v525_v32 = vld [vmem:[%s829_s7] ss:$0 sm:$0xff] }
  0x1c   :  { %504 = vmatmul.msk.bf16.vlgmr.msra.gmra.mxu2 %vm134_vm0, %v261_v10  ;;  %494 = vmatmul.msk.bf16.vlgmr.msra.gmra.mxu1 %vm134_vm0, %v505_v11  ;;  %v526_v36 = vld [vmem:[%s832_s10] ss:$0 sm:$0xff] }
  0x98   :  { %v147_v13 = vpop.f32.mrf.mxu0 }
  0x99   :  { %v160_v14 = vadd.f32 %v523_v12, %v147_v13  ;;  %v202_v15 = vpop.f32.mrf.mxu1  ;;  %v155_v24 = vadd.f32 %v522_v17, %v147_v13 }
  0x9b   :  { %v213_v16 = vrot.slane %v160_v14, 1  ;;  %v214_v19 = vperm.slane %v160_v14, 0 }
  0x9d   :  { %v215_v20 = vperm.slane %v213_v16, 0  ;;  %v218_v27 = vadd.f32 %v214_v19, %v202_v15 }
  0x9e   :  { %v207_v21 = vpop.f32.mrf.mxu3 }
  0x9f   :  { %v220_v22 = vadd.f32 %v215_v20, %v207_v21  ;;  %v294_v23 = vpop.f32.mrf.mxu2 }
  0xa0   :  { %v295_v25 = vadd.f32 %v524_v18, %v294_v23  ;;  %v149_v26 = vpop.f32.mrf.mxu0 }
  0xa1   :  { %527 = vtanh.f32 %v220_v22  ;;  %v204_v28 = vpop.f32.mrf.mxu1 }
  0xa2   :  { %v298_v29 = vadd.f32 %v295_v25, %v155_v24  ;;  %529 = vtanh.f32 %v218_v27 }
  0xa4   :  { %v299_v30 = vmul.f32 0.70710677, %v298_v29 }
  0xa6   :  { %531 = vtanh.f32 %v299_v30  ;;  %v209_v31 = vpop.f32.mrf.mxu3 }
  0xa7   :  { %v528_v33 = vpop.eup %527  ;;  %v296_v34 = vpop.f32.mrf.mxu2 }
  0xa8   :  { %v232_v35 = vmul.f32 %v528_v33, %v525_v32  ;;  %v530_v38 = vpop.eup %529 }
  0xa9   :  { %v230_v41 = vmul.f32 %v530_v38, %v525_v32 }
  0xaa   :  { %v240_v37 = vsel %vm134_vm0, %v232_v35, 0.0 }
  0xab   :  { %241 = vadd.xlane.f32.xlu0 %v240_v37  ;;  %v234_v43 = vsel %vm134_vm0, %v230_v41, 0.0 }
  0xac   :  { %v532_v39 = vpop.eup %531 }
  0xad   :  { %v305_v40 = vmul.f32 %v532_v39, %v526_v36 }
  0xaf   :  { %v307_v42 = vsel %vm306_vm1, %v305_v40, 0.0 }
  0xb0   :  { %308 = vadd.xlane.f32.xlu1 %v307_v42 }
  0xb3   :  { %235 = vadd.xlane.f32.xlu0 %v234_v43 }
 0x11e   :  { %v242_v47 = vpop.xlane.xlu0 %241 }
 0x11f   :  { %v250_v48 = vadd.f32 %v247_v46, %v242_v47 }
 0x121   :  { %v259_v49 = vsel %vm255_vm2, %v250_v48, -1e+30 }
 0x122   :  { %v325_v50 = vmax.f32 %v259_v49, -1e+30 }
 0x123   :  { %v309_v55 = vpop.xlane.xlu1 %308 }
 0x124   :  { %v326_v51 = vrot.slane %v325_v50, 4  ;;  %v312_v60 = vadd.f32 %v311_v54, %v309_v55 }
 0x126   :  { %v327_v52 = vmax.f32 %v325_v50, %v326_v51  ;;  %v236_v53 = vpop.xlane.xlu0 %235  ;;  %v315_v0 = vperm.slane %v312_v60, 1  ;;  %v314_v12 = vperm.slane %v312_v60, 0  ;;  %v113_v51 = vld [vmem:[#allocation4 + $0x8] sm:$0xff]  }
 0x127   :  { %v248_v56 = vadd.f32 %v247_v46, %v236_v53 }
 0x128   :  { %v328_v57 = vrot.slane %v327_v52, 2 }
 0x129   :  { %v257_v58 = vsel %vm255_vm2, %v248_v56, -1e+30  ;;  %v406_v56 = vunpack.c.l.bf16 %v113_v51 }
 0x12a   :  { %v329_v59 = vmax.f32 %v327_v52, %v328_v57  ;;  %v318_v61 = vmax.f32 %v257_v58, -1e+30  ;;  %v407_v57 = vunpack.c.h.bf16 %v113_v51 }
 0x12c   :  { %v330_v62 = vrot.slane %v329_v59, 1  ;;  %v319_v63 = vrot.slane %v318_v61, 4 }
 0x12e   :  { %v331_v1 = vmax.f32 %v329_v59, %v330_v62  ;;  %v320_v2 = vmax.f32 %v318_v61, %v319_v63 }
 0x130   :  { %v333_v3 = vmax.f32 %v331_v1, %v315_v0  ;;  %v321_v4 = vrot.slane %v320_v2, 2 }
 0x132   :  { %v336_v5 = vsub.f32 %v259_v49, %v333_v3  ;;  %v337_v6 = vsub.f32 -1e+30, %v333_v3  ;;  %v322_v8 = vmax.f32 %v320_v2, %v321_v4  ;;  %v347_v19 = vsub.f32 %v315_v0, %v333_v3  ;;  %v112_v2 = vld [vmem:[#allocation4] sm:$0xff]  }
 0x134   :  { %v342_v9 = vmul.f32 1.442695, %v336_v5  ;;  %v344_v10 = vmul.f32 1.442695, %v337_v6  ;;  %v323_v11 = vrot.slane %v322_v8, 1 }
 0x135   :  { %v350_v24 = vmul.f32 1.442695, %v347_v19 }
 0x136   :  { %533 = vpow2.f32 %v342_v9  ;;  %v324_v13 = vmax.f32 %v322_v8, %v323_v11 }
 0x137   :  { %535 = vpow2.f32 %v344_v10  ;;  %v405_v10 = vunpack.c.h.bf16 %v112_v2 }
 0x138   :  { %v332_v14 = vmax.f32 %v324_v13, %v314_v12  ;;  %v404_v13 = vunpack.c.l.bf16 %v112_v2 }
 0x13a   :  { %v334_v15 = vsub.f32 %v257_v58, %v332_v14  ;;  %v335_v16 = vsub.f32 -1e+30, %v332_v14  ;;  %v346_v28 = vsub.f32 %v314_v12, %v332_v14 }
 0x13c   :  { %v534_v17 = vpop.eup %533  ;;  %v338_v20 = vmul.f32 1.442695, %v334_v15  ;;  %v340_v21 = vmul.f32 1.442695, %v335_v16  ;;  %v348_v33 = vmul.f32 1.442695, %v346_v28 }
 0x13d   :  { %v536_v18 = vpop.eup %535 }
 0x13e   :  { %v359_v22 = vadd.f32 %v536_v18, %v534_v17  ;;  %537 = vpow2.f32 %v338_v20 }
 0x13f   :  { %539 = vpow2.f32 %v340_v21 }
 0x140   :  { %v360_v23 = vrot.slane %v359_v22, 4  ;;  %541 = vpow2.f32 %v350_v24 }
 0x141   :  { %543 = vpow2.f32 %v348_v33 }
 0x142   :  { %v361_v25 = vadd.f32 %v360_v23, %v359_v22 }
 0x144   :  { %v362_v26 = vrot.slane %v361_v25, 2  ;;  %v804_v27 = vpop.eup %537 }
 0x145   :  { %v540_v29 = vpop.eup %539 }
 0x146   :  { %v363_v30 = vadd.f32 %v362_v26, %v361_v25  ;;  %v352_v31 = vadd.f32 %v540_v29, %v804_v27  ;;  %v807_v36 = vpop.eup %541  ;;  %v431_v25 = vrot.slane %v772_v7, 1 }
 0x147   :  { %v544_v42 = vpop.eup %543 }
 0x148   :  { %v364_v32 = vrot.slane %v363_v30, 1  ;;  %v353_v34 = vrot.slane %v352_v31, 4 }
 0x14a   :  { %v365_v35 = vadd.f32 %v364_v32, %v363_v30  ;;  %v354_v37 = vadd.f32 %v353_v34, %v352_v31 }
 0x14c   :  { %v367_v38 = vadd.f32 %v807_v36, %v365_v35  ;;  %v355_v39 = vrot.slane %v354_v37, 2 }
 0x14e   :  { %545 = vrcp.f32 %v367_v38  ;;  %v356_v40 = vadd.f32 %v355_v39, %v354_v37  ;;  %v394_v48 = vand.u32 2147483648, %v367_v38  ;;  %v392_v50 = vand.u32 2147483647, %v367_v38 }
 0x14f   :  { %vm388_vm4 = vweird.f32 %v367_v38 }
 0x150   :  { %v357_v41 = vrot.slane %v356_v40, 1  ;;  %v395_v53 = vor.u32 1.1754944e-38, %v394_v48  ;;  %vm393_vm6 = vcmp.eq.f32.partialorder %v392_v50, 8.507059e+37 }
 0x152   :  { %v358_v43 = vadd.f32 %v357_v41, %v356_v40 }
 0x154   :  { %v546_v44 = vpop.eup %545  ;;  %v366_v46 = vadd.f32 %v544_v42, %v358_v43 }
 0x155   :  { %v384_v45 = vmul.f32 %v546_v44, %v367_v38  ;;  %vm389_vm3 = vweird.f32 %v546_v44 }
 0x156   :  { %547 = vrcp.f32 %v366_v46  ;;  %vm390_vm5 = vmor %vm388_vm4, %vm389_vm3  ;;  %v379_v1 = vand.u32 2147483648, %v366_v46  ;;  %v377_v4 = vand.u32 2147483647, %v366_v46  ;;  %vm373_vm8 = vweird.f32 %v366_v46 }
 0x157   :  { %v385_v47 = vsub.f32 1.0, %v384_v45 }
 0x158   :  { %v380_v11 = vor.u32 1.1754944e-38, %v379_v1  ;;  %vm378_vm10 = vcmp.eq.f32.partialorder %v377_v4, 8.507059e+37 }
 0x159   :  { %v386_v49 = vmul.f32 %v546_v44, %v385_v47 }
 0x15b   :  { %v387_v52 = vadd.f32 %v546_v44, %v386_v49 }
 0x15c   :  { %v548_v54 = vpop.eup %547 }
 0x15d   :  { %v391_v55 = vsel %vm390_vm5, %v546_v44, %v387_v52  ;;  %v369_v59 = vmul.f32 %v548_v54, %v366_v46  ;;  %vm374_vm7 = vweird.f32 %v548_v54 }
 0x15e   :  { %v396_v58 = vsel %vm393_vm6, %v395_v53, %v391_v55  ;;  %vm375_vm9 = vmor %vm373_vm8, %vm374_vm7 }
 0x15f   :  { %v400_v60 = vmul.f32 %v534_v17, %v396_v58  ;;  %v401_v61 = vmul.f32 %v536_v18, %v396_v58  ;;  %v370_v62 = vsub.f32 1.0, %v369_v59  ;;  %v403_v26 = vmul.f32 %v807_v36, %v396_v58 }
 0x161   :  { %v410_v63 = vmul.f32 %v406_v56, %v400_v60  ;;  %v411_v0 = vmul.f32 %v407_v57, %v401_v61  ;;  %v371_v3 = vmul.f32 %v548_v54, %v370_v62 }
 0x163   :  { %v421_v5 = vsel %vm134_vm0, %v410_v63, 0.0  ;;  %v422_v6 = vsel %vm134_vm0, %v411_v0, 0.0  ;;  %v372_v8 = vadd.f32 %v548_v54, %v371_v3 }
 0x164   :  { %v423_v9 = vadd.f32 %v422_v6, %v421_v5 }
 0x165   :  { %v376_v12 = vsel %vm375_vm9, %v548_v54, %v372_v8 }
 0x166   :  { %v424_v14 = vrot.slane %v423_v9, 4  ;;  %v381_v15 = vsel %vm378_vm10, %v380_v11, %v376_v12 }
 0x167   :  { %v398_v16 = vmul.f32 %v804_v27, %v381_v15  ;;  %v399_v17 = vmul.f32 %v540_v29, %v381_v15  ;;  %v402_v32 = vmul.f32 %v544_v42, %v381_v15  ;;  %v434_v27 = vmul.f32 %v431_v25, %v403_v26 }
 0x168   :  { %v425_v18 = vadd.f32 %v424_v14, %v423_v9 }
 0x169   :  { %v408_v19 = vmul.f32 %v404_v13, %v398_v16  ;;  %v409_v20 = vmul.f32 %v405_v10, %v399_v17  ;;  %v433_v37 = vmul.f32 %v402_v32, %v772_v7  ;;  %v438_v38 = vperm.slane %v434_v27, 0 }
 0x16a   :  { %v426_v21 = vrot.slane %v425_v18, 2 }
 0x16b   :  { %v412_v22 = vsel %vm134_vm0, %v408_v19, 0.0  ;;  %v413_v23 = vsel %vm134_vm0, %v409_v20, 0.0  ;;  %v437_v43 = vperm.slane %v433_v37, 0 }
 0x16c   :  { %v427_v24 = vadd.f32 %v426_v21, %v425_v18  ;;  %v414_v28 = vadd.f32 %v413_v23, %v412_v22 }
 0x16e   :  { %v415_v30 = vrot.slane %v414_v28, 4  ;;  %v428_v31 = vrot.slane %v427_v24, 1 }
 0x170   :  { %v416_v33 = vadd.f32 %v415_v30, %v414_v28  ;;  %v429_v34 = vadd.f32 %v428_v31, %v427_v24 }
 0x172   :  { %v417_v29 = vrot.slane %v416_v33, 2  ;;  %v442_v40 = vadd.f32 %v438_v38, %v429_v34 }
 0x174   :  { %v418_v35 = vadd.f32 %v417_v29, %v416_v33  ;;  %v445_v42 = vrot.slane %v442_v40, 7 }
 0x176   :  { %v419_v39 = vrot.slane %v418_v35, 1 }
 0x178   :  { %v420_v41 = vadd.f32 %v419_v39, %v418_v35 }
 0x17a   :  { %v441_v36 = vadd.f32 %v437_v43, %v420_v41 }
 0x17c   :  { %v447_v44 = vsel %vm446_vm11, %v445_v42, %v441_v36 }
 0x17d   :  { %449 = vst.msk [vmem:[#allocation12] sm:$0x3] %vm306_vm1, %v447_v44 }
 0x17e   :  { %460 = dma.vmem_to_hbm [thread:$0]  %s456_s12, 32, %s458_s22, [#allocation6]  }
 0x17f   :  { %675 = dma.done.wait [#allocation6], 32  }
 0x180   :  { %676 = vsyncadd [#allocation6], 4294967264 }
 0x181   :  { %465 = vsyncpa [#allocation5], 1 }
 0x182   :  { %466 = vsyncpa [#allocation8], 1 }
 0x183   :  { %467 = vsyncpa [#allocation11], 1 }
 0x184   :  { %468 = vsyncpa [#allocation6], 1 }

</bundles_post_ra>
